<compile_context>
chip_gen: v5e
topology: v5e:2x2
jax: 0.10.0
libtpu: 0.0.40
codegen_flags: <defaults>
</compile_context>

<pallas_src>
import functools

import jax
import jax.numpy as jnp
from jax.experimental import pallas as pl
from jax.experimental.pallas import tpu as pltpu


def _round_up(x, m):
    return (x + m - 1) // m * m


def mlp_kernel(x_ref, w1_ref, b1_ref, w2_ref, b2_ref, o_ref):
    # x_ref: (tm, SZ_IN)      w1_ref: (SZ_IN, HID_P)  b1_ref: (1, HID_P)
    # w2_ref: (HID_P, OUT_P)  b2_ref: (1, OUT_P)      o_ref: (tm, OUT_P)
    h = jnp.dot(x_ref[...], w1_ref[...], preferred_element_type=jnp.float32)
    h = jnp.maximum(h + b1_ref[...], 0.0)  # ReLU between layers (not after last)
    o = jnp.dot(h, w2_ref[...], preferred_element_type=jnp.float32)
    o_ref[...] = (o + b2_ref[...]).astype(o_ref.dtype)


def pad_params(w1, b1, w2, b2, *, use_bf16=False):
    """One-time lane padding of the (tiny) hidden/output dims to 128.

    The large K dim (sz_in) of W1 is left untouched. Call once and reuse
    across forward calls; padding columns are zero so results are exact."""
    sz_in, sz_hid = w1.shape
    sz_out = w2.shape[1]
    hid_p = _round_up(sz_hid, 128)
    out_p = _round_up(sz_out, 128)
    w1_dt = jnp.bfloat16 if use_bf16 else jnp.float32
    w1_p = jnp.zeros((sz_in, hid_p), w1_dt).at[:, :sz_hid].set(w1.astype(w1_dt))
    b1_p = jnp.zeros((1, hid_p), jnp.float32).at[0, :sz_hid].set(b1.astype(jnp.float32))
    w2_p = jnp.zeros((hid_p, out_p), jnp.float32).at[:sz_hid, :sz_out].set(
        w2.astype(jnp.float32))
    b2_p = jnp.zeros((1, out_p), jnp.float32).at[0, :sz_out].set(b2.astype(jnp.float32))
    return w1_p, b1_p, w2_p, b2_p


def _choose_tm(n, tm_max):
    # Row tile: multiple of 8 (f32 sublane), never larger than the array's row
    # extent (so the block never exceeds the array), capped at tm_max.
    if n <= 8:
        return n  # equals the full array dim -> always a legal block dim
    return max(8, min(tm_max, (n // 8) * 8))


@functools.partial(jax.jit, static_argnames=("tm", "sz_out"))
def mlp_forward_padded(fts, w1_p, b1_p, w2_p, b2_p, *, tm, sz_out):
    """Core fused forward on pre-padded params. fts: (N, sz_in), un-padded."""
    n, sz_in = fts.shape
    hid_p = w1_p.shape[1]
    out_p = w2_p.shape[1]
    grid = (pl.cdiv(n, tm),)

    flops = 2 * n * sz_in * hid_p + 2 * n * hid_p * out_p
    bytes_accessed = (
        fts.size * fts.dtype.itemsize
        + w1_p.size * w1_p.dtype.itemsize
        + (b1_p.size + w2_p.size + b2_p.size) * 4
        + n * out_p * 4
    )

    out = pl.pallas_call(
        mlp_kernel,
        out_shape=jax.ShapeDtypeStruct((n, out_p), jnp.float32),
        grid_spec=pltpu.PrefetchScalarGridSpec(
            num_scalar_prefetch=0,
            grid=grid,
            in_specs=[
                # x rows: K left at its true (un-padded) extent; last dim equals
                # the full array dim so it is exempt from the 128 rule.
                pl.BlockSpec((tm, sz_in), lambda i: (i, 0)),
                # Weights/biases: constant index_map -> resident across steps.
                pl.BlockSpec((sz_in, hid_p), lambda i: (0, 0)),
                pl.BlockSpec((1, hid_p), lambda i: (0, 0)),
                pl.BlockSpec((hid_p, out_p), lambda i: (0, 0)),
                pl.BlockSpec((1, out_p), lambda i: (0, 0)),
            ],
            out_specs=pl.BlockSpec((tm, out_p), lambda i: (i, 0)),
        ),
        compiler_params=pltpu.CompilerParams(
            dimension_semantics=("parallel",),
        ),
        cost_estimate=pl.CostEstimate(
            flops=flops, transcendentals=0, bytes_accessed=bytes_accessed
        ),
    )(fts, w1_p, b1_p, w2_p, b2_p)

    return out[:, :sz_out]


def mlp_forward(fts, adj, w1, b1, w2, b2, *, tm_max=512, use_bf16=False):
    """Convenience wrapper matching MLPModel.forward(fts, adj).

    For repeated calls in a loop, pad once with pad_params(...) and call
    mlp_forward_padded(...) directly to skip re-padding the weights."""
    del adj  # unused by the reference forward pass
    n = fts.shape[0]
    sz_out = w2.shape[1]
    w1_p, b1_p, w2_p, b2_p = pad_params(w1, b1, w2, b2, use_bf16=use_bf16)
    if use_bf16:
        fts = fts.astype(jnp.bfloat16)
    tm = _choose_tm(n, tm_max)
    return mlp_forward_padded(fts, w1_p, b1_p, w2_p, b2_p, tm=tm, sz_out=sz_out)


def init_params(key, sz_in=1433, sz_hid=32, sz_out=7):
    """Deterministic synthetic init mirroring nn.Linear shapes.

    Weights stored as [in, out] (transposed vs. PyTorch's [out, in])."""
    k1, k2, k3, k4 = jax.random.split(key, 4)
    bound1 = 1.0 / (sz_in ** 0.5)
    bound2 = 1.0 / (sz_hid ** 0.5)
    w1 = jax.random.uniform(k1, (sz_in, sz_hid), jnp.float32, -bound1, bound1)
    b1 = jax.random.uniform(k2, (sz_hid,), jnp.float32, -bound1, bound1)
    w2 = jax.random.uniform(k3, (sz_hid, sz_out), jnp.float32, -bound2, bound2)
    b2 = jax.random.uniform(k4, (sz_out,), jnp.float32, -bound2, bound2)
    return w1, b1, w2, b2


if __name__ == "__main__":
    key = jax.random.PRNGKey(0)
    k_fts, k_adj, k_par = jax.random.split(key, 3)

    # Small shapes consistent with the module: 8 nodes, sz_in=1433, hid=32, out=7.
    N, SZ_IN, SZ_HID, SZ_OUT = 8, 1433, 32, 7
    fts = jax.random.normal(k_fts, (N, SZ_IN), jnp.float32)
    adj = (jax.random.uniform(k_adj, (N, N)) > 0.7).astype(jnp.float32)  # unused

    w1, b1, w2, b2 = init_params(k_par, SZ_IN, SZ_HID, SZ_OUT)

    out = mlp_forward(fts, adj, w1, b1, w2, b2)
    out = jax.block_until_ready(out)

    # Cross-check against a pure-JAX reference of the same forward pass.
    ref = jnp.maximum(fts @ w1 + b1, 0.0) @ w2 + b2
    assert out.shape == (N, SZ_OUT)
    assert jnp.allclose(out, ref, atol=1e-4, rtol=1e-4)

    # Also exercise a row count that is not a multiple of the tile (boundary
    # block masking path) with the larger-tile configuration.
    N2 = 300
    fts2 = jax.random.normal(jax.random.PRNGKey(1), (N2, SZ_IN), jnp.float32)
    out2 = jax.block_until_ready(mlp_forward(fts2, None, w1, b1, w2, b2))
    ref2 = jnp.maximum(fts2 @ w1 + b1, 0.0) @ w2 + b2
    assert out2.shape == (N2, SZ_OUT)
    assert jnp.allclose(out2, ref2, atol=1e-4, rtol=1e-4)

    print("KERNEL_OK")
</pallas_src>

<mosaic_0001>
module attributes {stable_mosaic.version = 11 : i64} {
  func.func @mlp_kernel(%arg0: i32, %arg1: memref<8x1433xf32, #tpu.memory_space<vmem>>, %arg2: memref<1433x128xf32, #tpu.memory_space<vmem>>, %arg3: memref<1x128xf32, #tpu.memory_space<vmem>>, %arg4: memref<128x128xf32, #tpu.memory_space<vmem>>, %arg5: memref<1x128xf32, #tpu.memory_space<vmem>>, %arg6: memref<8x128xf32, #tpu.memory_space<vmem>>) attributes {dimension_semantics = [#tpu.dimension_semantics<parallel>], iteration_bounds = array<i64: 1>, scalar_prefetch = 0 : i64, scratch_operands = 0 : i64, tpu.core_type = #tpu.core_type<tc>, window_params = [{transform_indices = @transform_0, window_bounds = array<i64: 8, 1433>}, {pipeline_mode = #tpu.pipeline_mode<synchronous>, transform_indices = @transform_1, window_bounds = array<i64: 1433, 128>}, {pipeline_mode = #tpu.pipeline_mode<synchronous>, transform_indices = @transform_2, window_bounds = array<i64: 1, 128>}, {pipeline_mode = #tpu.pipeline_mode<synchronous>, transform_indices = @transform_3, window_bounds = array<i64: 128, 128>}, {pipeline_mode = #tpu.pipeline_mode<synchronous>, transform_indices = @transform_4, window_bounds = array<i64: 1, 128>}, {transform_indices = @transform_5, window_bounds = array<i64: 8, 128>}]} {
    %c0 = arith.constant 0 : index
    %c0_0 = arith.constant 0 : index
    %0 = vector.load %arg1[%c0, %c0_0] : memref<8x1433xf32, #tpu.memory_space<vmem>>, vector<8x1433xf32>
    %c0_1 = arith.constant 0 : index
    %c0_2 = arith.constant 0 : index
    %1 = vector.load %arg2[%c0_1, %c0_2] : memref<1433x128xf32, #tpu.memory_space<vmem>>, vector<1433x128xf32>
    %cst = arith.constant dense<0.000000e+00> : vector<8x128xf32>
    %2 = tpu.matmul %0, %1, %cst {dimension_numbers = #tpu.dot_dimension_numbers<[1], [0], [0], [1], [0, 0, 1, 1], [], []>} : vector<8x1433xf32>, vector<1433x128xf32>, vector<8x128xf32> -> vector<8x128xf32>
    %c0_3 = arith.constant 0 : index
    %c0_4 = arith.constant 0 : index
    %3 = vector.load %arg3[%c0_3, %c0_4] : memref<1x128xf32, #tpu.memory_space<vmem>>, vector<1x128xf32>
    %4 = vector.broadcast %3 : vector<1x128xf32> to vector<8x128xf32>
    %5 = arith.addf %2, %4 : vector<8x128xf32>
    %cst_5 = arith.constant 0.000000e+00 : f32
    %6 = vector.broadcast %cst_5 : f32 to vector<8x128xf32>
    %7 = arith.maximumf %5, %6 : vector<8x128xf32>
    %c0_6 = arith.constant 0 : index
    %c0_7 = arith.constant 0 : index
    %8 = vector.load %arg4[%c0_6, %c0_7] : memref<128x128xf32, #tpu.memory_space<vmem>>, vector<128x128xf32>
    %cst_8 = arith.constant dense<0.000000e+00> : vector<8x128xf32>
    %9 = tpu.matmul %7, %8, %cst_8 {dimension_numbers = #tpu.dot_dimension_numbers<[1], [0], [0], [1], [0, 0, 1, 1], [], []>} : vector<8x128xf32>, vector<128x128xf32>, vector<8x128xf32> -> vector<8x128xf32>
    %c0_9 = arith.constant 0 : index
    %c0_10 = arith.constant 0 : index
    %10 = vector.load %arg5[%c0_9, %c0_10] : memref<1x128xf32, #tpu.memory_space<vmem>>, vector<1x128xf32>
    %11 = vector.broadcast %10 : vector<1x128xf32> to vector<8x128xf32>
    %12 = arith.addf %9, %11 : vector<8x128xf32>
    %c0_11 = arith.constant 0 : index
    %c0_12 = arith.constant 0 : index
    %13 = vector.load %arg6[%c0_11, %c0_12] : memref<8x128xf32, #tpu.memory_space<vmem>>, vector<8x128xf32>
    tpu.vector_store %arg6[%c0_11, %c0_12], %12 {strides = array<i32>} : memref<8x128xf32, #tpu.memory_space<vmem>>, vector<8x128xf32>,
    return
  }
  func.func @transform_0(%arg0: i32) -> (i32, i32) {
    %c0_i32 = arith.constant 0 : i32
    %c0_i32_0 = arith.constant 0 : i32
    return %arg0, %c0_i32 : i32, i32
  }
  func.func @transform_1(%arg0: i32) -> (i32, i32) {
    %c0_i32 = arith.constant 0 : i32
    %c0_i32_0 = arith.constant 0 : i32
    %c0_i32_1 = arith.constant 0 : i32
    return %c0_i32, %c0_i32_0 : i32, i32
  }
  func.func @transform_2(%arg0: i32) -> (i32, i32) {
    %c0_i32 = arith.constant 0 : i32
    %c0_i32_0 = arith.constant 0 : i32
    %c0_i32_1 = arith.constant 0 : i32
    return %c0_i32, %c0_i32_0 : i32, i32
  }
  func.func @transform_3(%arg0: i32) -> (i32, i32) {
    %c0_i32 = arith.constant 0 : i32
    %c0_i32_0 = arith.constant 0 : i32
    %c0_i32_1 = arith.constant 0 : i32
    return %c0_i32, %c0_i32_0 : i32, i32
  }
  func.func @transform_4(%arg0: i32) -> (i32, i32) {
    %c0_i32 = arith.constant 0 : i32
    %c0_i32_0 = arith.constant 0 : i32
    %c0_i32_1 = arith.constant 0 : i32
    return %c0_i32, %c0_i32_0 : i32, i32
  }
  func.func @transform_5(%arg0: i32) -> (i32, i32) {
    %c0_i32 = arith.constant 0 : i32
    %c0_i32_0 = arith.constant 0 : i32
    return %arg0, %c0_i32 : i32, i32
  }
}

</mosaic_0001>

<bundles_post_ra>
// kernel: mlp_forward_padded.1
= control target key start
LH: loop header
LB: loop body
LE: loop exit
PB: predicated region body
PF: predicated region fallthrough
CT: control target
= control target key end

     0   :  { %10 = vsyncpa [#allocation3], 0  ;;  %s736_s0 = inlined_call_operand.hbm [shape: f32[8,1433], index: 0, kind: input, shape index: {}]   ;;  %s737_s1 = inlined_call_operand.hbm [shape: f32[1433,128], index: 1, kind: input, shape index: {}]   ;;  %s738_s2 = inlined_call_operand.vmem [shape: f32[1,128], index: 2, kind: input, shape index: {}]   ;;  %s739_s3 = inlined_call_operand.hbm [shape: f32[128,128], index: 3, kind: input, shape index: {}]   ;;  %s740_s4 = inlined_call_operand.vmem [shape: f32[1,128], index: 4, kind: input, shape index: {}]   ;;  %s741_s5 = inlined_call_operand.hbm [shape: f32[8,128], index: 5, kind: output, shape index: {}]  }
   0x1   :  { %11 = vsyncpa [#allocation6], 0  ;;  %s28_s20 = sshll.u32 %s737_s1, 4  ;;  %s29_s20 = int_to_ptr.hbm [resolvable:$true] %s28_s20 }
   0x2   :  { %12 = vsyncpa [#allocation4], 0  ;;  %s682_s21 = smov [#allocation5]   ;;  %s18_s25 = sshll.u32 %s736_s0, 4  ;;  %s19_s25 = int_to_ptr.hbm [resolvable:$true] %s18_s25 }
   0x3   :  { %s30_s22 = sshll.u32 %s682_s21, 4  ;;  %s683_s26 = smov 128   ;;  %s31_s22 = int_to_ptr.vmem [resolvable:$true] %s30_s22 }
   0x4   :  { %s684_s27 = smov 8   ;;  %s685_s28 = smov [#allocation2]  }
   0x5   :  { %36 = dma.hbm_to_vmem [thread:$0]  %s29_s20, 23040, %s31_s22, [#allocation6], %s683_s26, %s683_s26, %s684_s27  }
   0x6   :  { %s20_s29 = sshll.u32 %s685_s28, 4  ;;  %s43_s7 = sshll.u32 %s739_s3, 4  ;;  %s21_s29 = int_to_ptr.vmem [resolvable:$true] %s20_s29  ;;  %s44_s7 = int_to_ptr.hbm [resolvable:$true] %s43_s7 }
   0x7   :  { %23 = dma.hbm_to_vmem [thread:$0]  %s19_s25, 1536, %s21_s29, [#allocation3]  }
   0x8   :  { %s686_s1 = smov [#allocation7]  }
   0x9   :  { %s45_s8 = sshll.u32 %s686_s1, 4  ;;  %s46_s8 = int_to_ptr.vmem [resolvable:$true] %s45_s8 }
   0xa   :  { %51 = dma.hbm_to_vmem [thread:$0]  %s44_s7, 2048, %s46_s8, [#allocation6], %s683_s26, %s683_s26, %s684_s27  }
   0xb   :  { %676 = dma.done.wait [#allocation3], 1536  }
   0xc   :  { %677 = vsyncadd [#allocation3], 4294965760 }
   0xd   :  { %678 = dma.done.wait [#allocation6], 25088  }
   0xe   :  { %679 = vsyncadd [#allocation6], 4294942208  ;;  %v93_v0 = vld [vmem:[#allocation5 + $0x78] sm:$0xff]  ;;  %v92_v2 = vld [vmem:[#allocation5 + $0x70] sm:$0xff]  ;;  %vm266_vm0 = vcmask 1040384   ;;  %vm262_vm1 = vcmask 203776  }
   0xf   :  { %v125_v1 = vld [vmem:[#allocation5 + $0x178] sm:$0xff]  ;;  %270 = vmatpush.msra.mxu0 %v93_v0  ;;  %v124_v4 = vld [vmem:[#allocation5 + $0x170] sm:$0xff]  ;;  %v91_v5 = vld [vmem:[#allocation5 + $0x68] sm:$0xff]  ;;  %s687_s10 = smov [#allocation8]   ;;  %s559_s14 = sshll.u32 %s741_s5, 4  ;;  %s560_s14 = int_to_ptr.hbm [resolvable:$true] %s559_s14 }
  0x10   :  { %310 = vmatpush.msra.mxu2 %v125_v1  ;;  %v109_v3 = vld [vmem:[#allocation5 + $0xf8] sm:$0xff]  ;;  %v108_v6 = vld [vmem:[#allocation5 + $0xf0] sm:$0xff]  ;;  %v123_v7 = vld [vmem:[#allocation5 + $0x168] sm:$0xff]  ;;  %s557_s11 = sshll.u32 %s687_s10, 4  ;;  %s558_s11 = int_to_ptr.vmem [resolvable:$true] %s557_s11 }
  0x11   :  { %290 = vmatpush.msra.mxu1 %v109_v3  ;;  %271 = vmatpush.msra.mxu0 %v92_v2  ;;  %v107_v8 = vld [vmem:[#allocation5 + $0xe8] sm:$0xff]  ;;  %v90_v9 = vld [vmem:[#allocation5 + $0x60] sm:$0xff]  ;;  %v141_v12 = vld [vmem:[#allocation5 + $0x1f8] sm:$0xff] }
  0x12   :  { %311 = vmatpush.msra.mxu2 %v124_v4  ;;  %v122_v10 = vld [vmem:[#allocation5 + $0x160] sm:$0xff]  ;;  %v89_v13 = vld [vmem:[#allocation5 + $0x58] sm:$0xff]  ;;  %330 = vmatpush.msra.mxu3 %v141_v12  ;;  %v140_v16 = vld [vmem:[#allocation5 + $0x1f0] sm:$0xff] }
  0x13   :  { %291 = vmatpush.msra.mxu1 %v108_v6  ;;  %272 = vmatpush.msra.mxu0 %v91_v5  ;;  %v106_v11 = vld [vmem:[#allocation5 + $0xe0] sm:$0xff]  ;;  %v121_v14 = vld [vmem:[#allocation5 + $0x158] sm:$0xff]  ;;  %v88_v17 = vld [vmem:[#allocation5 + $0x50] sm:$0xff] }
  0x14   :  { %312 = vmatpush.msra.mxu2 %v123_v7  ;;  %v105_v15 = vld [vmem:[#allocation5 + $0xd8] sm:$0xff]  ;;  %v120_v18 = vld [vmem:[#allocation5 + $0x150] sm:$0xff]  ;;  %331 = vmatpush.msra.mxu3 %v140_v16  ;;  %v139_v19 = vld [vmem:[#allocation5 + $0x1e8] sm:$0xff] }
  0x15   :  { %292 = vmatpush.msra.mxu1 %v107_v8  ;;  %273 = vmatpush.msra.mxu0 %v90_v9  ;;  %v104_v20 = vld [vmem:[#allocation5 + $0xd0] sm:$0xff]  ;;  %v138_v21 = vld [vmem:[#allocation5 + $0x1e0] sm:$0xff]  ;;  %v87_v22 = vld [vmem:[#allocation5 + $0x48] sm:$0xff] }
  0x16   :  { %313 = vmatpush.msra.mxu2 %v122_v10  ;;  %v119_v23 = vld [vmem:[#allocation5 + $0x148] sm:$0xff]  ;;  %332 = vmatpush.msra.mxu3 %v139_v19  ;;  %v137_v25 = vld [vmem:[#allocation5 + $0x1d8] sm:$0xff]  ;;  %v86_v26 = vld [vmem:[#allocation5 + $0x40] sm:$0xff] }
  0x17   :  { %293 = vmatpush.msra.mxu1 %v106_v11  ;;  %274 = vmatpush.msra.mxu0 %v89_v13  ;;  %v103_v24 = vld [vmem:[#allocation5 + $0xc8] sm:$0xff]  ;;  %v118_v27 = vld [vmem:[#allocation5 + $0x140] sm:$0xff]  ;;  %v136_v29 = vld [vmem:[#allocation5 + $0x1d0] sm:$0xff] }
  0x18   :  { %314 = vmatpush.msra.mxu2 %v121_v14  ;;  %333 = vmatpush.msra.mxu3 %v138_v21  ;;  %v102_v28 = vld [vmem:[#allocation5 + $0xc0] sm:$0xff]  ;;  %v85_v30 = vld [vmem:[#allocation5 + $0x38] sm:$0xff]  ;;  %v135_v33 = vld [vmem:[#allocation5 + $0x1c8] sm:$0xff] }
  0x19   :  { %294 = vmatpush.msra.mxu1 %v105_v15  ;;  %275 = vmatpush.msra.mxu0 %v88_v17  ;;  %v117_v31 = vld [vmem:[#allocation5 + $0x138] sm:$0xff]  ;;  %v84_v34 = vld [vmem:[#allocation5 + $0x30] sm:$0xff]  ;;  %v134_v37 = vld [vmem:[#allocation5 + $0x1c0] sm:$0xff] }
  0x1a   :  { %315 = vmatpush.msra.mxu2 %v120_v18  ;;  %334 = vmatpush.msra.mxu3 %v137_v25  ;;  %v101_v32 = vld [vmem:[#allocation5 + $0xb8] sm:$0xff]  ;;  %v116_v35 = vld [vmem:[#allocation5 + $0x130] sm:$0xff]  ;;  %v83_v38 = vld [vmem:[#allocation5 + $0x28] sm:$0xff] }
  0x1b   :  { %295 = vmatpush.msra.mxu1 %v104_v20  ;;  %276 = vmatpush.msra.mxu0 %v87_v22  ;;  %v100_v36 = vld [vmem:[#allocation5 + $0xb0] sm:$0xff]  ;;  %v115_v39 = vld [vmem:[#allocation5 + $0x128] sm:$0xff]  ;;  %v133_v41 = vld [vmem:[#allocation5 + $0x1b8] sm:$0xff] }
  0x1c   :  { %316 = vmatpush.msra.mxu2 %v119_v23  ;;  %335 = vmatpush.msra.mxu3 %v136_v29  ;;  %v99_v40 = vld [vmem:[#allocation5 + $0xa8] sm:$0xff]  ;;  %v82_v42 = vld [vmem:[#allocation5 + $0x20] sm:$0xff]  ;;  %v132_v45 = vld [vmem:[#allocation5 + $0x1b0] sm:$0xff] }
  0x1d   :  { %296 = vmatpush.msra.mxu1 %v103_v24  ;;  %277 = vmatpush.msra.mxu0 %v86_v26  ;;  %v114_v43 = vld [vmem:[#allocation5 + $0x120] sm:$0xff]  ;;  %v81_v46 = vld [vmem:[#allocation5 + $0x18] sm:$0xff]  ;;  %v131_v49 = vld [vmem:[#allocation5 + $0x1a8] sm:$0xff] }
  0x1e   :  { %317 = vmatpush.msra.mxu2 %v118_v27  ;;  %336 = vmatpush.msra.mxu3 %v135_v33  ;;  %v98_v44 = vld [vmem:[#allocation5 + $0xa0] sm:$0xff]  ;;  %v113_v47 = vld [vmem:[#allocation5 + $0x118] sm:$0xff]  ;;  %v80_v50 = vld [vmem:[#allocation5 + $0x10] sm:$0xff] }
  0x1f   :  { %297 = vmatpush.msra.mxu1 %v102_v28  ;;  %278 = vmatpush.msra.mxu0 %v85_v30  ;;  %v97_v48 = vld [vmem:[#allocation5 + $0x98] sm:$0xff]  ;;  %v112_v51 = vld [vmem:[#allocation5 + $0x110] sm:$0xff]  ;;  %v130_v53 = vld [vmem:[#allocation5 + $0x1a0] sm:$0xff] }
  0x20   :  { %318 = vmatpush.msra.mxu2 %v117_v31  ;;  %337 = vmatpush.msra.mxu3 %v134_v37  ;;  %v96_v52 = vld [vmem:[#allocation5 + $0x90] sm:$0xff]  ;;  %v79_v54 = vld [vmem:[#allocation5 + $0x8] sm:$0xff]  ;;  %v129_v57 = vld [vmem:[#allocation5 + $0x198] sm:$0xff] }
  0x21   :  { %298 = vmatpush.msra.mxu1 %v101_v32  ;;  %279 = vmatpush.msra.mxu0 %v84_v34  ;;  %v111_v55 = vld [vmem:[#allocation5 + $0x108] sm:$0xff]  ;;  %v78_v58 = vld [vmem:[#allocation5] sm:$0xff]  ;;  %v157_v60 = vld [vmem:[#allocation5 + $0x278] sm:$0xff] }
  0x22   :  { %319 = vmatpush.msra.mxu2 %v116_v35  ;;  %338 = vmatpush.msra.mxu3 %v133_v41  ;;  %v95_v56 = vld [vmem:[#allocation5 + $0x88] sm:$0xff]  ;;  %v110_v59 = vld [vmem:[#allocation5 + $0x100] sm:$0xff]  ;;  %v189_v61 = vld [vmem:[#allocation5 + $0x378] sm:$0xff] }
  0x23   :  { %299 = vmatpush.msra.mxu1 %v100_v36  ;;  %280 = vmatpush.msra.mxu0 %v83_v38  ;;  %v94_v62 = vld [vmem:[#allocation5 + $0x80] sm:$0xff]  ;;  %v128_v63 = vld [vmem:[#allocation5 + $0x190] sm:$0xff]  ;;  %v173_v1 = vld [vmem:[#allocation5 + $0x2f8] sm:$0xff] }
  0x24   :  { %320 = vmatpush.msra.mxu2 %v115_v39  ;;  %339 = vmatpush.msra.mxu3 %v132_v45  ;;  %v156_v0 = vld [vmem:[#allocation5 + $0x270] sm:$0xff]  ;;  %v127_v3 = vld [vmem:[#allocation5 + $0x188] sm:$0xff]  ;;  %v126_v7 = vld [vmem:[#allocation5 + $0x180] sm:$0xff] }
  0x25   :  { %300 = vmatpush.msra.mxu1 %v99_v40  ;;  %281 = vmatpush.msra.mxu0 %v82_v42  ;;  %v188_v2 = vld [vmem:[#allocation5 + $0x370] sm:$0xff]  ;;  %v155_v4 = vld [vmem:[#allocation5 + $0x268] sm:$0xff]  ;;  %v154_v8 = vld [vmem:[#allocation5 + $0x260] sm:$0xff] }
  0x26   :  { %321 = vmatpush.msra.mxu2 %v114_v43  ;;  %340 = vmatpush.msra.mxu3 %v131_v49  ;;  %v172_v5 = vld [vmem:[#allocation5 + $0x2f0] sm:$0xff]  ;;  %v187_v6 = vld [vmem:[#allocation5 + $0x368] sm:$0xff]  ;;  %v186_v10 = vld [vmem:[#allocation5 + $0x360] sm:$0xff] }
  0x27   :  { %301 = vmatpush.msra.mxu1 %v98_v44  ;;  %282 = vmatpush.msra.mxu0 %v81_v46  ;;  %v171_v9 = vld [vmem:[#allocation5 + $0x2e8] sm:$0xff]  ;;  %v205_v11 = vld [vmem:[#allocation5 + $0x3f8] sm:$0xff]  ;;  %v170_v13 = vld [vmem:[#allocation5 + $0x2e0] sm:$0xff] }
  0x28   :  { %322 = vmatpush.msra.mxu2 %v113_v47  ;;  %341 = vmatpush.msra.mxu3 %v130_v53  ;;  %v153_v12 = vld [vmem:[#allocation5 + $0x258] sm:$0xff]  ;;  %v204_v15 = vld [vmem:[#allocation5 + $0x3f0] sm:$0xff]  ;;  %v203_v19 = vld [vmem:[#allocation5 + $0x3e8] sm:$0xff] }
  0x29   :  { %302 = vmatpush.msra.mxu1 %v97_v48  ;;  %283 = vmatpush.msra.mxu0 %v80_v50  ;;  %v185_v14 = vld [vmem:[#allocation5 + $0x358] sm:$0xff]  ;;  %v152_v16 = vld [vmem:[#allocation5 + $0x250] sm:$0xff]  ;;  %v151_v20 = vld [vmem:[#allocation5 + $0x248] sm:$0xff] }
  0x2a   :  { %323 = vmatpush.msra.mxu2 %v112_v51  ;;  %342 = vmatpush.msra.mxu3 %v129_v57  ;;  %v169_v17 = vld [vmem:[#allocation5 + $0x2d8] sm:$0xff]  ;;  %v184_v18 = vld [vmem:[#allocation5 + $0x350] sm:$0xff]  ;;  %v183_v22 = vld [vmem:[#allocation5 + $0x348] sm:$0xff] }
  0x2b   :  { %303 = vmatpush.msra.mxu1 %v96_v52  ;;  %284 = vmatpush.msra.mxu0 %v79_v54  ;;  %v168_v21 = vld [vmem:[#allocation5 + $0x2d0] sm:$0xff]  ;;  %v202_v23 = vld [vmem:[#allocation5 + $0x3e0] sm:$0xff]  ;;  %v167_v25 = vld [vmem:[#allocation5 + $0x2c8] sm:$0xff] }
  0x2c   :  { %324 = vmatpush.msra.mxu2 %v111_v55  ;;  %343 = vmatpush.msra.mxu3 %v128_v63  ;;  %v150_v24 = vld [vmem:[#allocation5 + $0x240] sm:$0xff]  ;;  %v201_v27 = vld [vmem:[#allocation5 + $0x3d8] sm:$0xff]  ;;  %v200_v31 = vld [vmem:[#allocation5 + $0x3d0] sm:$0xff] }
  0x2d   :  { %304 = vmatpush.msra.mxu1 %v95_v56  ;;  %285 = vmatpush.msra.mxu0 %v78_v58  ;;  %v182_v26 = vld [vmem:[#allocation5 + $0x340] sm:$0xff]  ;;  %v149_v28 = vld [vmem:[#allocation5 + $0x238] sm:$0xff]  ;;  %v148_v32 = vld [vmem:[#allocation5 + $0x230] sm:$0xff] }
  0x2e   :  { %325 = vmatpush.msra.mxu2 %v110_v59  ;;  %344 = vmatpush.msra.mxu3 %v127_v3  ;;  %v166_v29 = vld [vmem:[#allocation5 + $0x2c0] sm:$0xff]  ;;  %v181_v30 = vld [vmem:[#allocation5 + $0x338] sm:$0xff]  ;;  %v180_v34 = vld [vmem:[#allocation5 + $0x330] sm:$0xff] }
  0x2f   :  { %350 = vmatpush.msrb.mxu0 %v157_v60  ;;  %305 = vmatpush.msra.mxu1 %v94_v62  ;;  %v165_v33 = vld [vmem:[#allocation5 + $0x2b8] sm:$0xff]  ;;  %v199_v35 = vld [vmem:[#allocation5 + $0x3c8] sm:$0xff]  ;;  %v164_v37 = vld [vmem:[#allocation5 + $0x2b0] sm:$0xff] }
  0x30   :  { %390 = vmatpush.msrb.mxu2 %v189_v61  ;;  %345 = vmatpush.msra.mxu3 %v126_v7  ;;  %v147_v36 = vld [vmem:[#allocation5 + $0x228] sm:$0xff]  ;;  %v198_v39 = vld [vmem:[#allocation5 + $0x3c0] sm:$0xff]  ;;  %v197_v43 = vld [vmem:[#allocation5 + $0x3b8] sm:$0xff] }
  0x31   :  { %351 = vmatpush.msrb.mxu0 %v156_v0  ;;  %370 = vmatpush.msrb.mxu1 %v173_v1  ;;  %v179_v38 = vld [vmem:[#allocation5 + $0x328] sm:$0xff]  ;;  %v146_v40 = vld [vmem:[#allocation5 + $0x220] sm:$0xff]  ;;  %v145_v44 = vld [vmem:[#allocation5 + $0x218] sm:$0xff] }
  0x32   :  { %391 = vmatpush.msrb.mxu2 %v188_v2  ;;  %410 = vmatpush.msrb.mxu3 %v205_v11  ;;  %v163_v41 = vld [vmem:[#allocation5 + $0x2a8] sm:$0xff]  ;;  %v178_v42 = vld [vmem:[#allocation5 + $0x320] sm:$0xff]  ;;  %v177_v46 = vld [vmem:[#allocation5 + $0x318] sm:$0xff] }
  0x33   :  { %352 = vmatpush.msrb.mxu0 %v155_v4  ;;  %371 = vmatpush.msrb.mxu1 %v172_v5  ;;  %v162_v45 = vld [vmem:[#allocation5 + $0x2a0] sm:$0xff]  ;;  %v196_v47 = vld [vmem:[#allocation5 + $0x3b0] sm:$0xff]  ;;  %v161_v49 = vld [vmem:[#allocation5 + $0x298] sm:$0xff] }
  0x34   :  { %392 = vmatpush.msrb.mxu2 %v187_v6  ;;  %411 = vmatpush.msrb.mxu3 %v204_v15  ;;  %v144_v48 = vld [vmem:[#allocation5 + $0x210] sm:$0xff]  ;;  %v143_v51 = vld [vmem:[#allocation5 + $0x208] sm:$0xff]  ;;  %v66_v55 = vld [vmem:[#allocation2] sm:$0xff] }
  0x35   :  { %353 = vmatpush.msrb.mxu0 %v154_v8  ;;  %372 = vmatpush.msrb.mxu1 %v171_v9  ;;  %v176_v50 = vld [vmem:[#allocation5 + $0x310] sm:$0xff]  ;;  %v195_v52 = vld [vmem:[#allocation5 + $0x3a8] sm:$0xff]  ;;  %v142_v56 = vld [vmem:[#allocation5 + $0x200] sm:$0xff] }
  0x36   :  { %393 = vmatpush.msrb.mxu2 %v186_v10  ;;  %412 = vmatpush.msrb.mxu3 %v203_v19  ;;  %v160_v53 = vld [vmem:[#allocation5 + $0x290] sm:$0xff]  ;;  %v175_v54 = vld [vmem:[#allocation5 + $0x308] sm:$0xff]  ;;  %v174_v58 = vld [vmem:[#allocation5 + $0x300] sm:$0xff] }
  0x37   :  { %354 = vmatpush.msrb.mxu0 %v153_v12  ;;  %373 = vmatpush.msrb.mxu1 %v170_v13  ;;  %v159_v57 = vld [vmem:[#allocation5 + $0x288] sm:$0xff]  ;;  %v221_v59 = vld [vmem:[#allocation5 + $0x478] sm:$0xff]  ;;  %v68_v60 = vld [vmem:[#allocation2 + $0x10] sm:$0xff] }
  0x38   :  { %394 = vmatpush.msrb.mxu2 %v185_v14  ;;  %413 = vmatpush.msrb.mxu3 %v202_v23  ;;  %v158_v61 = vld [vmem:[#allocation5 + $0x280] sm:$0xff]  ;;  %v253_v62 = vld [vmem:[#allocation5 + $0x578] sm:$0xff]  ;;  %v67_v0 = vld [vmem:[#allocation2 + $0x8] sm:$0xff] }
  0x39   :  { %355 = vmatpush.msrb.mxu0 %v152_v16  ;;  %374 = vmatpush.msrb.mxu1 %v169_v17  ;;  %v194_v63 = vld [vmem:[#allocation5 + $0x3a0] sm:$0xff]  ;;  %v69_v1 = vld [vmem:[#allocation2 + $0x18] sm:$0xff]  ;;  %v220_v2 = vld [vmem:[#allocation5 + $0x470] sm:$0xff] }
  0x3a   :  { %395 = vmatpush.msrb.mxu2 %v184_v18  ;;  %414 = vmatpush.msrb.mxu3 %v201_v27  ;;  %v237_v3 = vld [vmem:[#allocation5 + $0x4f8] sm:$0xff]  ;;  %v252_v4 = vld [vmem:[#allocation5 + $0x570] sm:$0xff]  ;;  %v219_v6 = vld [vmem:[#allocation5 + $0x468] sm:$0xff] }
  0x3b   :  { %356 = vmatpush.msrb.mxu0 %v151_v20  ;;  %375 = vmatpush.msrb.mxu1 %v168_v21  ;;  %v193_v5 = vld [vmem:[#allocation5 + $0x398] sm:$0xff]  ;;  %v236_v7 = vld [vmem:[#allocation5 + $0x4f0] sm:$0xff]  ;;  %v251_v8 = vld [vmem:[#allocation5 + $0x568] sm:$0xff] }
  0x3c   :  { %396 = vmatpush.msrb.mxu2 %v183_v22  ;;  %415 = vmatpush.msrb.mxu3 %v200_v31  ;;  %v192_v9 = vld [vmem:[#allocation5 + $0x390] sm:$0xff]  ;;  %v218_v10 = vld [vmem:[#allocation5 + $0x460] sm:$0xff]  ;;  %v235_v11 = vld [vmem:[#allocation5 + $0x4e8] sm:$0xff] }
  0x3d   :  { %357 = vmatpush.msrb.mxu0 %v150_v24  ;;  %376 = vmatpush.msrb.mxu1 %v167_v25  ;;  %v250_v12 = vld [vmem:[#allocation5 + $0x560] sm:$0xff]  ;;  %v191_v13 = vld [vmem:[#allocation5 + $0x388] sm:$0xff]  ;;  %v72_v14 = vld [vmem:[#allocation2 + $0x30] sm:$0xff] }
  0x3e   :  { %397 = vmatpush.msrb.mxu2 %v182_v26  ;;  %416 = vmatpush.msrb.mxu3 %v199_v35  ;;  %v217_v15 = vld [vmem:[#allocation5 + $0x458] sm:$0xff]  ;;  %v234_v16 = vld [vmem:[#allocation5 + $0x4e0] sm:$0xff]  ;;  %v216_v21 = vld [vmem:[#allocation5 + $0x450] sm:$0xff] }
  0x3f   :  { %358 = vmatpush.msrb.mxu0 %v149_v28  ;;  %377 = vmatpush.msrb.mxu1 %v166_v29  ;;  %v249_v17 = vld [vmem:[#allocation5 + $0x558] sm:$0xff]  ;;  %v190_v18 = vld [vmem:[#allocation5 + $0x380] sm:$0xff]  ;;  %v248_v23 = vld [vmem:[#allocation5 + $0x550] sm:$0xff] }
  0x40   :  { %398 = vmatpush.msrb.mxu2 %v181_v30  ;;  %417 = vmatpush.msrb.mxu3 %v198_v39  ;;  %v70_v19 = vld [vmem:[#allocation2 + $0x20] sm:$0xff]  ;;  %v73_v20 = vld [vmem:[#allocation2 + $0x38] sm:$0xff]  ;;  %v71_v24 = vld [vmem:[#allocation2 + $0x28] sm:$0xff] }
  0x41   :  { %359 = vmatpush.msrb.mxu0 %v148_v32  ;;  %378 = vmatpush.msrb.mxu1 %v165_v33  ;;  %v233_v22 = vld [vmem:[#allocation5 + $0x4d8] sm:$0xff]  ;;  %v215_v25 = vld [vmem:[#allocation5 + $0x448] sm:$0xff]  ;;  %v232_v26 = vld [vmem:[#allocation5 + $0x4d0] sm:$0xff] }
  0x42   :  { %399 = vmatpush.msrb.mxu2 %v180_v34  ;;  %418 = vmatpush.msrb.mxu3 %v197_v43  ;;  %v247_v27 = vld [vmem:[#allocation5 + $0x548] sm:$0xff]  ;;  %v214_v28 = vld [vmem:[#allocation5 + $0x440] sm:$0xff]  ;;  %v257_v29 = vld [vmem:[#allocation5 + $0x598] sm:$0x1] }
  0x43   :  { %360 = vmatpush.msrb.mxu0 %v147_v36  ;;  %379 = vmatpush.msrb.mxu1 %v164_v37  ;;  %v231_v30 = vld [vmem:[#allocation5 + $0x4c8] sm:$0xff]  ;;  %v246_v31 = vld [vmem:[#allocation5 + $0x540] sm:$0xff]  ;;  %v213_v32 = vld [vmem:[#allocation5 + $0x438] sm:$0xff] }
  0x44   :  { %400 = vmatpush.msrb.mxu2 %v179_v38  ;;  %419 = vmatpush.msrb.mxu3 %v196_v47  ;;  %v256_v33 = vld [vmem:[#allocation5 + $0x590] sm:$0xff]  ;;  %v230_v34 = vld [vmem:[#allocation5 + $0x4c0] sm:$0xff]  ;;  %v245_v35 = vld [vmem:[#allocation5 + $0x538] sm:$0xff] }
  0x45   :  { %361 = vmatpush.msrb.mxu0 %v146_v40  ;;  %380 = vmatpush.msrb.mxu1 %v163_v41  ;;  %v212_v36 = vld [vmem:[#allocation5 + $0x430] sm:$0xff]  ;;  %v255_v37 = vld [vmem:[#allocation5 + $0x588] sm:$0xff]  ;;  %v229_v38 = vld [vmem:[#allocation5 + $0x4b8] sm:$0xff] }
  0x46   :  { %401 = vmatpush.msrb.mxu2 %v178_v42  ;;  %420 = vmatpush.msrb.mxu3 %v195_v52  ;;  %v244_v39 = vld [vmem:[#allocation5 + $0x530] sm:$0xff]  ;;  %v211_v40 = vld [vmem:[#allocation5 + $0x428] sm:$0xff]  ;;  %v254_v41 = vld [vmem:[#allocation5 + $0x580] sm:$0xff] }
  0x47   :  { %362 = vmatpush.msrb.mxu0 %v145_v44  ;;  %381 = vmatpush.msrb.mxu1 %v162_v45  ;;  %v228_v42 = vld [vmem:[#allocation5 + $0x4b0] sm:$0xff]  ;;  %v243_v43 = vld [vmem:[#allocation5 + $0x528] sm:$0xff]  ;;  %v210_v44 = vld [vmem:[#allocation5 + $0x420] sm:$0xff] }
  0x48   :  { %402 = vmatpush.msrb.mxu2 %v177_v46  ;;  %286 = vmatmul.f32.vlgmr.msra.gmra.mxu0 %v66_v55  ;;  %v77_v45 = vld [vmem:[#allocation2 + $0x58] sm:$0xff]  ;;  %v227_v46 = vld [vmem:[#allocation5 + $0x4a8] sm:$0xff]  ;;  %v242_v47 = vld [vmem:[#allocation5 + $0x520] sm:$0xff] }
  0x49   :  { %363 = vmatpush.msrb.mxu0 %v144_v48  ;;  %382 = vmatpush.msrb.mxu1 %v161_v49  ;;  %v209_v48 = vld [vmem:[#allocation5 + $0x418] sm:$0xff]  ;;  %v226_v49 = vld [vmem:[#allocation5 + $0x4a0] sm:$0xff]  ;;  %v224_v55 = vld [vmem:[#allocation5 + $0x490] sm:$0xff] }
  0x4a   :  { %403 = vmatpush.msrb.mxu2 %v176_v50  ;;  %421 = vmatpush.msrb.mxu3 %v194_v63  ;;  %v241_v50 = vld [vmem:[#allocation5 + $0x518] sm:$0xff]  ;;  %v75_v63 = vld [vmem:[#allocation2 + $0x48] sm:$0xff] }
  0x4b   :  { %364 = vmatpush.msrb.mxu0 %v143_v51  ;;  %383 = vmatpush.msrb.mxu1 %v160_v53  ;;  %v208_v51 = vld [vmem:[#allocation5 + $0x410] sm:$0xff]  ;;  %v225_v52 = vld [vmem:[#allocation5 + $0x498] sm:$0xff] }
  0x4c   :  { %404 = vmatpush.msrb.mxu2 %v175_v54  ;;  %306 = vmatmul.f32.vlgmr.msra.gmra.mxu1 %v67_v0  ;;  %v240_v53 = vld [vmem:[#allocation5 + $0x510] sm:$0xff]  ;;  %v207_v54 = vld [vmem:[#allocation5 + $0x408] sm:$0xff]  ;;  %v526_v0 = vld [vmem:[#allocation7 + $0x78] sm:$0xff] }
  0x4d   :  { %365 = vmatpush.msrb.mxu0 %v142_v56  ;;  %384 = vmatpush.msrb.mxu1 %v159_v57  ;;  %v239_v56 = vld [vmem:[#allocation5 + $0x508] sm:$0xff]  ;;  %v206_v57 = vld [vmem:[#allocation5 + $0x400] sm:$0xff] }
  0x4e   :  { %405 = vmatpush.msrb.mxu2 %v174_v58  ;;  %346 = vmatmul.f32.vlgmr.msra.gmra.mxu3 %v69_v1  ;;  %v223_v58 = vld [vmem:[#allocation5 + $0x488] sm:$0xff]  ;;  %v525_v1 = vld [vmem:[#allocation7 + $0x70] sm:$0xff] }
  0x4f   :  { %430 = vmatpush.msra.mxu0 %v221_v59  ;;  %326 = vmatmul.f32.vlgmr.msra.gmra.mxu2 %v68_v60  ;;  %v238_v59 = vld [vmem:[#allocation5 + $0x500] sm:$0xff] }
  0x50   :  { %385 = vmatpush.msrb.mxu1 %v158_v61  ;;  %470 = vmatpush.msra.mxu2 %v253_v62  ;;  %v74_v60 = vld [vmem:[#allocation2 + $0x40] sm:$0xff]  ;;  %v76_v61 = vld [vmem:[#allocation2 + $0x50] sm:$0xff] }
  0x51   :  { %431 = vmatpush.msra.mxu0 %v220_v2  ;;  %422 = vmatpush.msrb.mxu3 %v193_v5  ;;  %v222_v62 = vld [vmem:[#allocation5 + $0x480] sm:$0xff]  ;;  %v524_v2 = vld [vmem:[#allocation7 + $0x68] sm:$0xff]  ;;  %v521_v5 = vld [vmem:[#allocation7 + $0x50] sm:$0xff] }
  0x52   :  { %450 = vmatpush.msra.mxu1 %v237_v3  ;;  %471 = vmatpush.msra.mxu2 %v252_v4  ;;  %v523_v3 = vld [vmem:[#allocation7 + $0x60] sm:$0xff]  ;;  %v522_v4 = vld [vmem:[#allocation7 + $0x58] sm:$0xff] }
  0x53   :  { %432 = vmatpush.msra.mxu0 %v219_v6  ;;  %423 = vmatpush.msrb.mxu3 %v192_v9  ;;  %v520_v6 = vld [vmem:[#allocation7 + $0x48] sm:$0xff]  ;;  %v578_v9 = vld [vmem:[%s738_s2] ss:$0 sm:$0xff] }
  0x54   :  { %451 = vmatpush.msra.mxu1 %v236_v7  ;;  %472 = vmatpush.msra.mxu2 %v251_v8  ;;  %v519_v7 = vld [vmem:[#allocation7 + $0x40] sm:$0xff]  ;;  %v518_v8 = vld [vmem:[#allocation7 + $0x38] sm:$0xff] }
  0x55   :  { %433 = vmatpush.msra.mxu0 %v218_v10  ;;  %424 = vmatpush.msrb.mxu3 %v191_v13  ;;  %v517_v10 = vld [vmem:[#allocation7 + $0x30] sm:$0xff] }
  0x56   :  { %452 = vmatpush.msra.mxu1 %v235_v11  ;;  %473 = vmatpush.msra.mxu2 %v250_v12  ;;  %v516_v12 = vld [vmem:[#allocation7 + $0x28] sm:$0xff] }
  0x57   :  { %406 = vmatmul.f32.vlgmr.msrb.gmra.mxu2 %v72_v14  ;;  %434 = vmatpush.msra.mxu0 %v217_v15  ;;  %v515_v14 = vld [vmem:[#allocation7 + $0x20] sm:$0xff] }
  0x58   :  { %453 = vmatpush.msra.mxu1 %v234_v16  ;;  %474 = vmatpush.msra.mxu2 %v249_v17  ;;  %v514_v16 = vld [vmem:[#allocation7 + $0x18] sm:$0xff] }
  0x59   :  { %425 = vmatpush.msrb.mxu3 %v190_v18  ;;  %366 = vmatmul.f32.vlgmr.msrb.gmra.mxu0 %v70_v19  ;;  %v513_v18 = vld [vmem:[#allocation7 + $0x10] sm:$0xff] }
  0x5a   :  { %426 = vmatmul.f32.vlgmr.msrb.gmra.mxu3 %v73_v20  ;;  %435 = vmatpush.msra.mxu0 %v216_v21  ;;  %v512_v20 = vld [vmem:[#allocation7 + $0x8] sm:$0xff] }
  0x5b   :  { %454 = vmatpush.msra.mxu1 %v233_v22  ;;  %475 = vmatpush.msra.mxu2 %v248_v23  ;;  %v511_v22 = vld [vmem:[#allocation7] sm:$0xff] }
  0x5c   :  { %386 = vmatmul.f32.vlgmr.msrb.gmra.mxu1 %v71_v24  ;;  %436 = vmatpush.msra.mxu0 %v215_v25 }
  0x5d   :  { %455 = vmatpush.msra.mxu1 %v232_v26  ;;  %476 = vmatpush.msra.mxu2 %v247_v27 }
  0x5e   :  { %437 = vmatpush.msra.mxu0 %v214_v28  ;;  %570 = vmatpush.msk.msra.mxu3 %vm266_vm0, %v257_v29 }
  0x5f   :  { %456 = vmatpush.msra.mxu1 %v231_v30  ;;  %477 = vmatpush.msra.mxu2 %v246_v31 }
  0x60   :  { %438 = vmatpush.msra.mxu0 %v213_v32  ;;  %503 = vmatpush.msra.mxu3 %v256_v33 }
  0x61   :  { %457 = vmatpush.msra.mxu1 %v230_v34  ;;  %478 = vmatpush.msra.mxu2 %v245_v35 }
  0x62   :  { %439 = vmatpush.msra.mxu0 %v212_v36  ;;  %504 = vmatpush.msra.mxu3 %v255_v37 }
  0x63   :  { %458 = vmatpush.msra.mxu1 %v229_v38  ;;  %479 = vmatpush.msra.mxu2 %v244_v39 }
  0x64   :  { %440 = vmatpush.msra.mxu0 %v211_v40  ;;  %505 = vmatpush.msra.mxu3 %v254_v41 }
  0x65   :  { %459 = vmatpush.msra.mxu1 %v228_v42  ;;  %480 = vmatpush.msra.mxu2 %v243_v43  ;;  %v579_v42 = vld [vmem:[%s740_s4] ss:$0 sm:$0xff] }
  0x66   :  { %441 = vmatpush.msra.mxu0 %v210_v44  ;;  %571 = vmatmul.msk.f32.vlgmr.msra.gmra.mxu3 %vm262_vm1, %v77_v45 }
  0x67   :  { %460 = vmatpush.msra.mxu1 %v227_v46  ;;  %481 = vmatpush.msra.mxu2 %v242_v47 }
  0x68   :  { %442 = vmatpush.msra.mxu0 %v209_v48  ;;  %531 = vmatpush.msrb.mxu3 %v526_v0 }
  0x69   :  { %461 = vmatpush.msra.mxu1 %v226_v49  ;;  %482 = vmatpush.msra.mxu2 %v241_v50 }
  0x6a   :  { %443 = vmatpush.msra.mxu0 %v208_v51  ;;  %532 = vmatpush.msrb.mxu3 %v525_v1 }
  0x6b   :  { %462 = vmatpush.msra.mxu1 %v225_v52  ;;  %483 = vmatpush.msra.mxu2 %v240_v53 }
  0x6c   :  { %444 = vmatpush.msra.mxu0 %v207_v54  ;;  %533 = vmatpush.msrb.mxu3 %v524_v2 }
  0x6d   :  { %463 = vmatpush.msra.mxu1 %v224_v55  ;;  %484 = vmatpush.msra.mxu2 %v239_v56 }
  0x6e   :  { %445 = vmatpush.msra.mxu0 %v206_v57  ;;  %534 = vmatpush.msrb.mxu3 %v523_v3 }
  0x6f   :  { %464 = vmatpush.msra.mxu1 %v223_v58  ;;  %485 = vmatpush.msra.mxu2 %v238_v59 }
  0x70   :  { %446 = vmatmul.f32.vlgmr.msra.gmra.mxu0 %v74_v60  ;;  %486 = vmatmul.f32.vlgmr.msra.gmra.mxu2 %v76_v61 }
  0x71   :  { %465 = vmatpush.msra.mxu1 %v222_v62  ;;  %535 = vmatpush.msrb.mxu3 %v522_v4 }
  0x72   :  { %466 = vmatmul.f32.vlgmr.msra.gmra.mxu1 %v75_v63 }
  0x73   :  { %536 = vmatpush.msrb.mxu3 %v521_v5 }
  0x75   :  { %537 = vmatpush.msrb.mxu3 %v520_v6 }
  0x77   :  { %538 = vmatpush.msrb.mxu3 %v519_v7 }
  0x79   :  { %539 = vmatpush.msrb.mxu3 %v518_v8 }
  0x7b   :  { %540 = vmatpush.msrb.mxu3 %v517_v10 }
  0x7d   :  { %541 = vmatpush.msrb.mxu3 %v516_v12 }
  0x7f   :  { %542 = vmatpush.msrb.mxu3 %v515_v14 }
  0x81   :  { %543 = vmatpush.msrb.mxu3 %v514_v16 }
  0x83   :  { %544 = vmatpush.msrb.mxu3 %v513_v18 }
  0x85   :  { %545 = vmatpush.msrb.mxu3 %v512_v20 }
  0x87   :  { %546 = vmatpush.msrb.mxu3 %v511_v22 }
  0xc5   :  { %v287_v11 = vpop.f32.mrf.mxu0 }
  0xc6   :  { %v288_v13 = vadd.f32 %v578_v9, %v287_v11 }
  0xc9   :  { %v307_v15 = vpop.f32.mrf.mxu1 }
  0xca   :  { %v308_v17 = vadd.f32 %v307_v15, %v288_v13 }
  0xd1   :  { %v347_v23 = vpop.f32.mrf.mxu3 }
  0xd2   :  { %v327_v19 = vpop.f32.mrf.mxu2 }
  0xd3   :  { %v328_v21 = vadd.f32 %v327_v19, %v308_v17 }
  0xd5   :  { %v348_v24 = vadd.f32 %v347_v23, %v328_v21 }
  0xd6   :  { %v367_v25 = vpop.f32.mrf.mxu0 }
  0xd7   :  { %v368_v26 = vadd.f32 %v367_v25, %v348_v24 }
  0xd9   :  { %v387_v27 = vpop.f32.mrf.mxu1 }
  0xda   :  { %v388_v28 = vadd.f32 %v387_v27, %v368_v26  ;;  %v407_v29 = vpop.f32.mrf.mxu2 }
  0xdc   :  { %v408_v30 = vadd.f32 %v407_v29, %v388_v28 }
  0xdd   :  { %v427_v31 = vpop.f32.mrf.mxu3 }
  0xde   :  { %v428_v32 = vadd.f32 %v427_v31, %v408_v30 }
  0xe9   :  { %v507_v38 = vpop.f32.mrf.mxu3 }
  0xed   :  { %v447_v33 = vpop.f32.mrf.mxu0 }
  0xee   :  { %v448_v34 = vadd.f32 %v447_v33, %v428_v32 }
  0xef   :  { %v467_v35 = vpop.f32.mrf.mxu1 }
  0xf0   :  { %v468_v36 = vadd.f32 %v467_v35, %v448_v34 }
  0xf3   :  { %v487_v37 = vpop.f32.mrf.mxu2 }
  0xf4   :  { %v488_v39 = vadd.f32 %v487_v37, %v468_v36 }
  0xf6   :  { %v508_v40 = vadd.f32 %v507_v38, %v488_v39 }
  0xf8   :  { %v510_v41 = vmax.f32 %v508_v40, 0.0 }
  0xfa   :  { %547 = vmatmul.f32.vlgmr.msrb.gmra.mxu3 %v510_v41 }
 0x17d   :  { %v548_v43 = vpop.f32.mrf.mxu3 }
 0x17e   :  { %v549_v44 = vadd.f32 %v579_v42, %v548_v43 }
 0x180   :  { %551 = vst [vmem:[#allocation8] sm:$0xff] %v549_v44 }
 0x181   :  { %562 = dma.vmem_to_hbm [thread:$0]  %s558_s11, 128, %s560_s14, [#allocation4]  }
 0x182   :  { %680 = dma.done.wait [#allocation4], 128  }
 0x183   :  { %681 = vsyncadd [#allocation4], 4294967168 }
 0x184   :  { %567 = vsyncpa [#allocation3], 1 }
 0x185   :  { %568 = vsyncpa [#allocation6], 1 }
 0x186   :  { %569 = vsyncpa [#allocation4], 1 }

</bundles_post_ra>
